<compile_context>
chip_gen: v6e
topology: v6e:2x2x1
jax: 0.10.0
libtpu: 0.0.40
codegen_flags: <defaults>
</compile_context>

<pallas_src>
import functools

import numpy as np

import jax
import jax.numpy as jnp
from jax import lax
from jax.experimental import pallas as pl
from jax.experimental.pallas import tpu as pltpu

_LANES = 128
_MIN_SUBLANES = 8
_TR_MAX = 4096  # sublanes per tile: 2 x (4096*128*4B) = 4 MiB/block, x2 buffers = 8 MiB


def _next_pow2(n):
    n = int(n)
    return 1 if n <= 1 else 1 << (n - 1).bit_length()


def _pow_static(x, e):
    """x ** e for a static Python exponent (x assumed >= 0 where needed)."""
    ef = float(e)
    if ef == 1.0:
        return x
    if ef.is_integer():
        return lax.integer_pow(x, int(ef))
    return jnp.power(x, jnp.float32(ef))


def _pers_pow(diff, q):
    """|diff| ** q with the abs skipped when q is an even integer."""
    qf = float(q)
    if qf == 2.0:
        return diff * diff
    if qf == 1.0:
        return jnp.abs(diff)
    if qf.is_integer() and int(qf) % 2 == 0:
        return lax.integer_pow(diff, int(qf))
    if qf.is_integer():
        return lax.integer_pow(jnp.abs(diff), int(qf))
    return jnp.power(jnp.abs(diff), jnp.float32(qf))


def _summary_loss_kernel(nx_ref, bd_ref, o_ref, acc_x_ref, acc_y_ref, *, q, p, tr):
    """Per-tile: acc_region += partial-reduced |death - birth|^q.

    nx_ref : SMEM (1,) int32 -- number of leading grid tiles that belong to X.
    bd_ref : VMEM (2, tr, 128) f32 -- [0] births, [1] deaths of this tile.
    o_ref  : VMEM (1, 1) f32 -- resident output, written on the last step.
    acc_*  : VMEM (8, 128) f32 -- one-vreg accumulators (X and Y regions).
    """
    i = pl.program_id(0)

    @pl.when(i == 0)
    def _():
        acc_x_ref[...] = jnp.zeros_like(acc_x_ref)
        acc_y_ref[...] = jnp.zeros_like(acc_y_ref)

    diff = bd_ref[1, :, :] - bd_ref[0, :, :]                 # (tr, 128), pure VPU
    term = _pers_pow(diff, q)
    # Tile-aligned view; reduce across vregs (elementwise adds, no XLU).
    partial = jnp.sum(
        term.reshape(tr // _MIN_SUBLANES, _MIN_SUBLANES, _LANES), axis=0
    )                                                        # (8, 128)

    nx = nx_ref[0]

    @pl.when(i < nx)
    def _():
        acc_x_ref[...] += partial

    @pl.when(i >= nx)
    def _():
        acc_y_ref[...] += partial

    @pl.when(i == pl.num_programs(0) - 1)
    def _():
        sx = jnp.sum(jnp.sum(acc_x_ref[...], axis=0, keepdims=True),
                     axis=1, keepdims=True)                  # (1, 1)
        sy = jnp.sum(jnp.sum(acc_y_ref[...], axis=0, keepdims=True),
                     axis=1, keepdims=True)                  # (1, 1)
        o_ref[...] = _pow_static(jnp.abs(sy - sx), p)


def _run_kernel(bd, num_x_tiles, *, q, p, tr):
    """bd: (2, R, 128) f32 with R % tr == 0. Returns the scalar loss."""
    r = bd.shape[1]
    grid = (r // tr,)
    out = pl.pallas_call(
        functools.partial(_summary_loss_kernel, q=q, p=p, tr=tr),
        out_shape=jax.ShapeDtypeStruct((1, 1), jnp.float32),
        grid_spec=pltpu.PrefetchScalarGridSpec(
            num_scalar_prefetch=1,
            grid=grid,
            in_specs=[pl.BlockSpec((2, tr, _LANES), lambda i, nx: (0, i, 0))],
            out_specs=pl.BlockSpec((1, 1), lambda i, nx: (0, 0)),
            scratch_shapes=[
                pltpu.VMEM((_MIN_SUBLANES, _LANES), jnp.float32),
                pltpu.VMEM((_MIN_SUBLANES, _LANES), jnp.float32),
            ],
        ),
        compiler_params=pltpu.CompilerParams(
            dimension_semantics=("arbitrary",)),
    )(jnp.asarray([num_x_tiles], jnp.int32), bd)
    return out[0, 0]


def summary_statistic_loss(X_diagrams, Y_diagrams=None, *, p=1.0, q=2.0,
                           max_tile_sublanes=_TR_MAX):
    """Pallas equivalent of SummaryStatisticLoss(summary_statistic='total_persistence').

    X_diagrams / Y_diagrams: lists of (N_i, 2) arrays of (birth, death) pairs
    (the `.diagram` attribute of each PersistenceInformation entry).
    p: outer norm exponent (module default 1.0).
    q: total_persistence exponent (torch_topological default 2).
    """
    assert float(q) > 0.0, "q must be positive for zero-padded pairs to be inert"

    y_diags = list(Y_diagrams) if Y_diagrams is not None else []
    x_diags = list(X_diagrams)

    # Pack on host (numpy) unless the diagrams already live on device.
    on_device = any(isinstance(d, jax.Array) for d in (x_diags + y_diags))
    xp = jnp if on_device else np

    def pack_region(diags):
        if len(diags) == 0:
            z = xp.zeros((0,), np.float32)
            return z, z
        arrs = [xp.asarray(d, np.float32).reshape(-1, 2) for d in diags]
        cat = xp.concatenate(arrs, axis=0)
        return cat[:, 0], cat[:, 1]

    bx, dx = pack_region(x_diags)
    by, dy = pack_region(y_diags)
    mx, my = int(bx.shape[0]), int(by.shape[0])

    if mx + my == 0:
        # Empty diagrams: stat == 0 on both sides -> |0|^p == 0.
        return jnp.float32(0.0)

    # --- Bucketed padding (limits recompiles; zero pairs contribute 0) ------
    base = _LANES * _MIN_SUBLANES                     # 1024 pairs = one minimal tile

    def bucket(m):
        if m == 0:
            return 0
        return base * _next_pow2(-(-m // base))       # pow2 multiple of 1024

    mx_pad = bucket(mx)
    my_pad = bucket(my)

    mt = max(_MIN_SUBLANES, 1 << (max(int(max_tile_sublanes), 1).bit_length() - 1))
    cap_pairs = mt * _LANES
    nonzero = [b for b in (mx_pad, my_pad) if b > 0]
    tile_pairs = min(nonzero + [cap_pairs])           # divides every nonzero bucket
    tr = tile_pairs // _LANES

    num_x_tiles = mx_pad // tile_pairs
    r_total = (mx_pad + my_pad) // _LANES

    def pad_both(vx, vy):
        vx = xp.pad(vx, (0, mx_pad - vx.shape[0]))
        vy = xp.pad(vy, (0, my_pad - vy.shape[0]))
        return xp.concatenate([vx, vy])

    births = pad_both(bx, by)
    deaths = pad_both(dx, dy)
    bd = xp.stack([births, deaths]).reshape(2, r_total, _LANES)

    return _run_kernel(bd, num_x_tiles, q=q, p=p, tr=tr)


def _reference_loss(X_diagrams, Y_diagrams=None, *, p=1.0, q=2.0):
    def stat(diags):
        total = jnp.float32(0.0)
        for d in diags:
            d = jnp.asarray(d, jnp.float32)
            total = total + jnp.sum(jnp.abs(d[:, 1] - d[:, 0]) ** q)
        return total

    s_x = stat(X_diagrams)
    if Y_diagrams is None:
        return jnp.abs(s_x) ** p
    return jnp.abs(stat(Y_diagrams) - s_x) ** p


if __name__ == "__main__":
    key = jax.random.PRNGKey(0)

    def make_diagrams(key, sizes):
        diags = []
        for n in sizes:
            key, kb, kl = jax.random.split(key, 3)
            births = jax.random.uniform(kb, (n, 1), jnp.float32)
            lifetimes = jax.random.uniform(kl, (n, 1), jnp.float32)
            diags.append(jnp.concatenate([births, births + lifetimes], axis=1))
        return key, diags

    # --- Small case: one tile per region (grid=(2,)) -----------------------
    key, X = make_diagrams(key, sizes=[37, 20, 11])
    key, Y = make_diagrams(key, sizes=[29, 16])

    loss_xy = summary_statistic_loss(X, Y, p=1.0, q=2.0)
    jax.block_until_ready(loss_xy)
    ref_xy = _reference_loss(X, Y, p=1.0, q=2.0)
    assert jnp.allclose(loss_xy, ref_xy, rtol=1e-4, atol=1e-4), (loss_xy, ref_xy)

    loss_x = summary_statistic_loss(X, None, p=1.0, q=2.0)
    jax.block_until_ready(loss_x)
    ref_x = _reference_loss(X, None, p=1.0, q=2.0)
    assert jnp.allclose(loss_x, ref_x, rtol=1e-4, atol=1e-4), (loss_x, ref_x)

    # Non-integer exponents exercise the general pow paths.
    loss_q3 = summary_statistic_loss(X, Y, p=2.0, q=1.5)
    jax.block_until_ready(loss_q3)
    ref_q3 = _reference_loss(X, Y, p=2.0, q=1.5)
    assert jnp.allclose(loss_q3, ref_q3, rtol=1e-4, atol=1e-4), (loss_q3, ref_q3)

    # --- Larger case: multi-tile grid + host-numpy packing path ------------
    key, Xb = make_diagrams(key, sizes=[600, 700])
    key, Yb = make_diagrams(key, sizes=[500])
    Xb_np = [np.asarray(d) for d in Xb]
    Yb_np = [np.asarray(d) for d in Yb]
    loss_big = summary_statistic_loss(Xb_np, Yb_np, p=1.0, q=2.0,
                                      max_tile_sublanes=8)
    jax.block_until_ready(loss_big)
    ref_big = _reference_loss(Xb, Yb, p=1.0, q=2.0)
    assert jnp.allclose(loss_big, ref_big, rtol=1e-4, atol=1e-3), (loss_big, ref_big)

    print("KERNEL_OK")
</pallas_src>

<mosaic_0001>
module attributes {stable_mosaic.version = 11 : i64} {
  func.func @_summary_loss_kernel(%arg0: i32, %arg1: memref<1xi32, #tpu.memory_space<smem>>, %arg2: memref<2x8x128xf32, #tpu.memory_space<vmem>>, %arg3: memref<1x1xf32, #tpu.memory_space<vmem>>, %arg4: memref<8x128xf32, #tpu.memory_space<vmem>>, %arg5: memref<8x128xf32, #tpu.memory_space<vmem>>) attributes {dimension_semantics = [#tpu.dimension_semantics<arbitrary>], iteration_bounds = array<i64: 2>, scalar_prefetch = 1 : i64, scratch_operands = 2 : i64, tpu.core_type = #tpu.core_type<tc>, window_params = [{transform_indices = @transform_0, window_bounds = array<i64: 2, 8, 128>}, {pipeline_mode = #tpu.pipeline_mode<synchronous>, transform_indices = @transform_1, window_bounds = array<i64: 1, 1>}]} {
    %c0_i32 = arith.constant 0 : i32
    %0 = arith.cmpi eq, %arg0, %c0_i32 : i32
    %1 = arith.extui %0 : i1 to i32
    %c0_i32_0 = arith.constant 0 : i32
    %2 = arith.cmpi ne, %1, %c0_i32_0 : i32
    scf.if %2 {
      %cst_9 = arith.constant 0.000000e+00 : f32
      %21 = vector.broadcast %cst_9 : f32 to vector<8x128xf32>
      %c0_10 = arith.constant 0 : index
      %c0_11 = arith.constant 0 : index
      %22 = vector.load %arg4[%c0_10, %c0_11] : memref<8x128xf32, #tpu.memory_space<vmem>>, vector<8x128xf32>
      tpu.vector_store %arg4[%c0_10, %c0_11], %21 {strides = array<i32>} : memref<8x128xf32, #tpu.memory_space<vmem>>, vector<8x128xf32>,
      %cst_12 = arith.constant 0.000000e+00 : f32
      %23 = vector.broadcast %cst_12 : f32 to vector<8x128xf32>
      %c0_13 = arith.constant 0 : index
      %c0_14 = arith.constant 0 : index
      %24 = vector.load %arg5[%c0_13, %c0_14] : memref<8x128xf32, #tpu.memory_space<vmem>>, vector<8x128xf32>
      tpu.vector_store %arg5[%c0_13, %c0_14], %23 {strides = array<i32>} : memref<8x128xf32, #tpu.memory_space<vmem>>, vector<8x128xf32>,
    } else {
    }
    %c1 = arith.constant 1 : index
    %c0 = arith.constant 0 : index
    %c0_1 = arith.constant 0 : index
    %3 = vector.load %arg2[%c1, %c0, %c0_1] : memref<2x8x128xf32, #tpu.memory_space<vmem>>, vector<1x8x128xf32>
    %4 = vector.shape_cast %3 : vector<1x8x128xf32> to vector<8x128xf32>
    %c0_2 = arith.constant 0 : index
    %c0_3 = arith.constant 0 : index
    %c0_4 = arith.constant 0 : index
    %5 = vector.load %arg2[%c0_2, %c0_3, %c0_4] : memref<2x8x128xf32, #tpu.memory_space<vmem>>, vector<1x8x128xf32>
    %6 = vector.shape_cast %5 : vector<1x8x128xf32> to vector<8x128xf32>
    %7 = arith.subf %4, %6 : vector<8x128xf32>
    %8 = arith.mulf %7, %7 : vector<8x128xf32>
    %9 = vector.shape_cast %8 : vector<8x128xf32> to vector<1x8x128xf32>
    %cst = arith.constant dense<0.000000e+00> : vector<8x128xf32>
    %10 = vector.multi_reduction <add>, %9, %cst [0] : vector<1x8x128xf32> to vector<8x128xf32>
    %c0_5 = arith.constant 0 : index
    %11 = memref.load %arg1[%c0_5] : memref<1xi32, #tpu.memory_space<smem>>
    %12 = arith.cmpi slt, %arg0, %11 : i32
    %13 = arith.extui %12 : i1 to i32
    %c0_i32_6 = arith.constant 0 : i32
    %14 = arith.cmpi ne, %13, %c0_i32_6 : i32
    scf.if %14 {
      %c0_9 = arith.constant 0 : index
      %c0_10 = arith.constant 0 : index
      %21 = vector.load %arg4[%c0_9, %c0_10] : memref<8x128xf32, #tpu.memory_space<vmem>>, vector<8x128xf32>
      %22 = arith.addf %21, %10 : vector<8x128xf32>
      %c0_11 = arith.constant 0 : index
      %c0_12 = arith.constant 0 : index
      %23 = vector.load %arg4[%c0_11, %c0_12] : memref<8x128xf32, #tpu.memory_space<vmem>>, vector<8x128xf32>
      tpu.vector_store %arg4[%c0_11, %c0_12], %22 {strides = array<i32>} : memref<8x128xf32, #tpu.memory_space<vmem>>, vector<8x128xf32>,
    } else {
    }
    %15 = arith.cmpi sge, %arg0, %11 : i32
    %16 = arith.extui %15 : i1 to i32
    %c0_i32_7 = arith.constant 0 : i32
    %17 = arith.cmpi ne, %16, %c0_i32_7 : i32
    scf.if %17 {
      %c0_9 = arith.constant 0 : index
      %c0_10 = arith.constant 0 : index
      %21 = vector.load %arg5[%c0_9, %c0_10] : memref<8x128xf32, #tpu.memory_space<vmem>>, vector<8x128xf32>
      %22 = arith.addf %21, %10 : vector<8x128xf32>
      %c0_11 = arith.constant 0 : index
      %c0_12 = arith.constant 0 : index
      %23 = vector.load %arg5[%c0_11, %c0_12] : memref<8x128xf32, #tpu.memory_space<vmem>>, vector<8x128xf32>
      tpu.vector_store %arg5[%c0_11, %c0_12], %22 {strides = array<i32>} : memref<8x128xf32, #tpu.memory_space<vmem>>, vector<8x128xf32>,
    } else {
    }
    %c1_i32 = arith.constant 1 : i32
    %18 = arith.cmpi eq, %arg0, %c1_i32 : i32
    %19 = arith.extui %18 : i1 to i32
    %c0_i32_8 = arith.constant 0 : i32
    %20 = arith.cmpi ne, %19, %c0_i32_8 : i32
    scf.if %20 {
      %c0_9 = arith.constant 0 : index
      %c0_10 = arith.constant 0 : index
      %21 = vector.load %arg4[%c0_9, %c0_10] : memref<8x128xf32, #tpu.memory_space<vmem>>, vector<8x128xf32>
      %cst_11 = arith.constant dense<0.000000e+00> : vector<128xf32>
      %22 = vector.multi_reduction <add>, %21, %cst_11 [0] : vector<8x128xf32> to vector<128xf32>
      %23 = vector.shape_cast %22 : vector<128xf32> to vector<1x128xf32>
      %cst_12 = arith.constant dense<0.000000e+00> : vector<1xf32>
      %24 = vector.multi_reduction <add>, %23, %cst_12 [1] : vector<1x128xf32> to vector<1xf32>
      %25 = vector.shape_cast %24 : vector<1xf32> to vector<1x1xf32>
      %c0_13 = arith.constant 0 : index
      %c0_14 = arith.constant 0 : index
      %26 = vector.load %arg5[%c0_13, %c0_14] : memref<8x128xf32, #tpu.memory_space<vmem>>, vector<8x128xf32>
      %cst_15 = arith.constant dense<0.000000e+00> : vector<128xf32>
      %27 = vector.multi_reduction <add>, %26, %cst_15 [0] : vector<8x128xf32> to vector<128xf32>
      %28 = vector.shape_cast %27 : vector<128xf32> to vector<1x128xf32>
      %cst_16 = arith.constant dense<0.000000e+00> : vector<1xf32>
      %29 = vector.multi_reduction <add>, %28, %cst_16 [1] : vector<1x128xf32> to vector<1xf32>
      %30 = vector.shape_cast %29 : vector<1xf32> to vector<1x1xf32>
      %31 = arith.subf %30, %25 : vector<1x1xf32>
      %32 = math.absf %31 : vector<1x1xf32>
      %c0_17 = arith.constant 0 : index
      %c0_18 = arith.constant 0 : index
      %33 = vector.load %arg3[%c0_17, %c0_18] : memref<1x1xf32, #tpu.memory_space<vmem>>, vector<1x1xf32>
      tpu.vector_store %arg3[%c0_17, %c0_18], %32 {strides = array<i32>} : memref<1x1xf32, #tpu.memory_space<vmem>>, vector<1x1xf32>,
    } else {
    }
    return
  }
  func.func @transform_0(%arg0: i32, %arg1: memref<1xi32, #tpu.memory_space<smem>>) -> (i32, i32, i32) {
    %c0_i32 = arith.constant 0 : i32
    %c0_i32_0 = arith.constant 0 : i32
    %c0_i32_1 = arith.constant 0 : i32
    return %c0_i32, %arg0, %c0_i32_0 : i32, i32, i32
  }
  func.func @transform_1(%arg0: i32, %arg1: memref<1xi32, #tpu.memory_space<smem>>) -> (i32, i32) {
    %c0_i32 = arith.constant 0 : i32
    %c0_i32_0 = arith.constant 0 : i32
    %c0_i32_1 = arith.constant 0 : i32
    return %c0_i32, %c0_i32_0 : i32, i32
  }
}

</mosaic_0001>

<bundles_post_ra>
// kernel: tpu_custom_call.1
= control target key start
LH: loop header
LB: loop body
LE: loop exit
PB: predicated region body
PF: predicated region fallthrough
CT: control target
= control target key end

     0   :  { %s526_s0 = inlined_call_operand.<no memory space> [shape: s32[1], index: 0, kind: input, shape index: {}]   ;;  %s527_s1 = inlined_call_operand.hbm [shape: f32[2,16,128], index: 1, kind: input, shape index: {}]   ;;  %s528_s2 = inlined_call_operand.hbm [shape: f32[1,1], index: 2, kind: output, shape index: {}]  }
   0x1   :  { %7 = sst [smem:[#allocation5]] %s526_s0 }
   0x2   :  { %8 = vsyncpa [#allocation7], 0 }
   0x3   :  { %10 = vsyncpa [#allocation7 + $0x1], 0 }
   0x4   :  { %11 = vsyncpa [#allocation8], 0  ;;  %s416_s11 = smov 0   ;;  %s418_s12 = smov 0  }
   0x5   :  { %s420_s13 = smov 0   ;;  %s422_s14 = smov 0  }
   0x6 LB: > { %s435_s0 = sadd.s32 4294967295, %s390_s14   ;;  %s438_s15 = sadd.s32 1, %s390_s14   ;;  %s390_s14 = sphi %s422_s14, %s536_s14   ;;  %s386_s13 = sphi %s420_s13, %s535_s13   ;;  %s382_s12 = sphi %s418_s12, %s534_s12   ;;  %s378_s11 = sphi %s416_s11, %s533_s11  }
   0x7   : > { %s21_s16 = ssub.s32 %s390_s14, %s438_s15  ;;  %s24_s17 = sadd.s32 1, %s386_s13 }
   0x8   : > { %p22_p0 = scmp.eq.s32.totalorder %s21_s16, 0  ;;  %p31_p1 = scmp.ne.s32.totalorder %s386_s13, %s382_s12 }
   0x9   : > { %p32_p2 = scmp.eq.s32.totalorder %s390_s14, 0  ;;  %p37_p3 = scmp.ne.s32.totalorder %s382_s12, %s378_s11 }
   0xa   : > { %s448_s18 = scalar_select %p22_p0, %s386_s13, %s24_s17  }
   0xb   : > { %p33_p4 = por %p32_p2, %p31_p1  ;;  %p38_p5 = scmp.eq.s32.totalorder %s435_s0, 0 }
   0xc   : > { %p260_p6 = scmp.lt.s32.totalorder %s390_s14, 2  ;;  %s82_s20 = sand.u32 1, %s386_s13  }
   0xd   : > { %p452_p7 = por %p38_p5, %p37_p3  ;;  %s237_s21 = sshll.u32 %s82_s20, 4 }
   0xe   : > { %s238_s22 = sshll.u32 %s390_s14, 7  ;;  %s86_s26 = scalar_lea.vmem [#allocation6], %s237_s21 }
   0xf   : > { %s530_s19 = scalar_select %p452_p7, 1, 0 }
  0x10   : > { %s461_s25 = scalar_lea.hbm %s527_s1, %s238_s22  ;;  %s92_s27 = sshll.u32 %s86_s26, 4  ;;  %s463_s27 = int_to_ptr.vmem [resolvable:$true] %s92_s27 }
  0x11   : > { %p465_p8 = pnand %p260_p6, %p33_p4  ;;  %s469_s29 = scalar_lea.sflag [#allocation7], %s82_s20 }
  0x12   : > { %s300_s30 = scalar_lea.hbm %s461_s25, 256  ;;  %s305_s5 = scalar_lea.hbm %s527_s1, 512 }
  0x13   : > { %p301_p9 = scmp.ne.s32.totalorder %s461_s25, %s300_s30  ;;  %p302_p10 = pneg %p465_p8 }
  0x14   : > { %p306_p13 = scmp.lt.s32.totalorder %s461_s25, %s527_s1  ;;  %p307_p0 = scmp.lt.s32.totalorder %s305_s5, %s300_s30 }
  0x15   : > { %p303_p11 = pnand %p302_p10, %p301_p9 }
  0x16   : > { %p308_p1 = por %p307_p0, %p306_p13 }
  0x17   : > { %p304_p12 = pneg %p303_p11 }
  0x19   : > { %p309_p2 = pnand %p308_p1, %p304_p12 }
  0x1b   : > { %312 = shalt.err (!%p309_p2)
}
  0x1c   : > { %s313_s8 = scalar_lea.vmem %s463_s27, 256  ;;  %s392_s9 = smov [#allocation6]  }
  0x1d   : > { %p314_p3 = scmp.ne.s32.totalorder %s463_s27, %s313_s8  ;;  %s318_s10 = sshll.u32 %s392_s9, 4  ;;  %s319_s10 = int_to_ptr.vmem [resolvable:$false] %s318_s10 }
  0x1e   : > { %s320_s11 = scalar_lea.vmem %s319_s10, 512  ;;  %p321_p6 = scmp.lt.s32.totalorder %s463_s27, %s319_s10 }
  0x1f   : > { %p316_p4 = pnand %p314_p3, %p302_p10  ;;  %p322_p9 = scmp.lt.s32.totalorder %s320_s11, %s313_s8 }
  0x21   : > { %p317_p5 = pneg %p316_p4  ;;  %p323_p11 = por %p322_p9, %p321_p6 }
  0x23   : > { %p324_p7 = pnand %p323_p11, %p317_p5 }
  0x25   : > { %327 = shalt.err (!%p324_p7)
}
  0x26   : > { %s393_s16 = smov 256   ;;  %s394_s17 = smov 128  }
  0x27   : > { %s395_s20 = smov 8   ;;  %p239_p10 = scmp.ge.s32.totalorder %s390_s14, 1 }
  0x28   : > { %259 = dma.hbm_to_vmem [thread:$0]  (!%p465_p8), %s461_s25, 256, %s463_s27, %s469_s29, %s393_s16, %s394_s17, %s395_s20  }
  0x29   : > { %p100_p12 = scmp.lt.s32.totalorder %s390_s14, 3 }
  0x2b   : > { %p101_p13 = pnand %p239_p10, %p100_p12 }
  0x2c   : > { %s106_s21 = sand.u32 (!%p101_p13), 1, %s382_s12   ;;  %p532_p7 = scmp.ne.s32.totalorder (!%p101_p13), %s530_s19, 0 }
  0x2d   : > { %104 = sbr.rel (%p101_p13) target bundleno = 270 (0x10e), region = 24  ;;  %s240_s22 = sshll.u32 (!%p101_p13), %s106_s21, 4 }
  0x2e   : > { %s107_s23 = scalar_lea.sflag (!%p101_p13), [#allocation7], %s106_s21  ;;  %s110_s24 = scalar_lea.vmem (!%p101_p13), [#allocation6], %s240_s22 }
  0x32   : > { %369 = dma.done.wait (%p532_p7), %s107_s23, 256  }
  0x33   : > { %371 = vsyncadd (%p532_p7), %s107_s23, 4294967040  ;;  %p241_p0 = scmp.ne.s32.totalorder %s435_s0, 0 }
  0x35   : > { %127 = sbr.rel (%p241_p0) target bundleno = 60 (0x3c), region = 32 }
  0x3a   : > { %v396_v0 = vmov 0.0  }
  0x3b   : > { %128 = vst [vmem:[#allocation2] sm:$0xff] %v396_v0  ;;  %129 = vst [vmem:[#allocation3] sm:$0xff] %v396_v0 }
  0x3c PF: > { %v242_v1 = vld [vmem:[%s110_s24 + $0x8] sm:$0xff]  ;;  %v132_v2 = vld [vmem:[%s110_s24] sm:$0xff]  ;;  %s136_s14 = sld [smem:[#allocation5]] }
  0x3d   : > { %v133_v3 = vsub.f32 %v242_v1, %v132_v2 }
  0x3f   : > { %v134_v4 = vmul.f32 %v133_v3, %v133_v3 }
  0x42   : > { %p243_p8 = scmp.ge.s32.totalorder %s435_s0, %s136_s14 }
  0x44   : > { %140 = sbr.rel (%p243_p8) target bundleno = 77 (0x4d), region = 36 }
  0x49   : > { %v141_v5 = vld [vmem:[#allocation2] sm:$0xff] }
  0x4a   : > { %v142_v6 = vadd.f32 %v141_v5, %v134_v4 }
  0x4c   : > { %143 = vst [vmem:[#allocation2] sm:$0xff] %v142_v6 }
  0x4d PF: > { %p244_p1 = scmp.lt.s32.totalorder %s435_s0, %s136_s14 }
  0x4f   : > { %147 = sbr.rel (%p244_p1) target bundleno = 88 (0x58), region = 40 }
  0x54   : > { %v148_v7 = vld [vmem:[#allocation3] sm:$0xff] }
  0x55   : > { %v149_v8 = vadd.f32 %v148_v7, %v134_v4 }
  0x57   : > { %150 = vst [vmem:[#allocation3] sm:$0xff] %v149_v8 }
  0x58 PF: > { %p245_p2 = scmp.ne.s32.totalorder %s435_s0, 1 }
  0x5a   : > { %154 = sbr.rel (%p245_p2) target bundleno = 255 (0xff), region = 44 }
  0x5f   : > { %v155_v9 = vld [vmem:[#allocation2] sm:$0xff]  ;;  %v164_v10 = vld [vmem:[#allocation3] sm:$0xff]  ;;  %vm175_vm0 = vcmask 0  }
  0x60   : > { %v156_v11 = vrot.slane %v155_v9, 4  ;;  %v165_v12 = vrot.slane %v164_v10, 4 }
  0x62   : > { %v157_v13 = vadd.f32 %v156_v11, %v155_v9  ;;  %v166_v14 = vadd.f32 %v165_v12, %v164_v10 }
  0x64   : > { %v158_v15 = vrot.slane %v157_v13, 2  ;;  %v167_v16 = vrot.slane %v166_v14, 2 }
  0x66   : > { %v159_v17 = vadd.f32 %v158_v15, %v157_v13  ;;  %v168_v18 = vadd.f32 %v167_v16, %v166_v14 }
  0x68   : > { %v160_v19 = vrot.slane %v159_v17, 1  ;;  %v169_v20 = vrot.slane %v168_v18, 1 }
  0x6a   : > { %v161_v21 = vadd.f32 %v160_v19, %v159_v17  ;;  %v170_v22 = vadd.f32 %v169_v20, %v168_v18 }
  0x6c   : > { %162 = vadd.xlane.f32.xlu0 %v161_v21 }
  0x70   : > { %171 = vadd.xlane.f32.xlu0 %v170_v22 }
  0xf5   : > { %v163_v23 = vpop.xlane.xlu0 %162 }
  0xf9   : > { %v172_v24 = vpop.xlane.xlu0 %171 }
  0xfa   : > { %v173_v25 = vsub.f32 %v172_v24, %v163_v23 }
  0xfc   : > { %v174_v26 = vand.u32 2147483647, %v173_v25 }
  0xfe   : > { %176 = vst.msk [vmem:[#allocation9] sm:$0x1] %vm175_vm0, %v174_v26 }
  0xff PF: > { %p261_p3 = scmp.eq.s32.totalorder %s435_s0, 1  ;;  %s397_s19 = smov [#allocation9]  }
 0x100   : > { %s184_s25 = sshll.u32 %s397_s19, 4  ;;  %s185_s25 = int_to_ptr.vmem [resolvable:$true] %s184_s25 }
 0x101   : > { %s328_s26 = scalar_lea.vmem %s185_s25, 16  ;;  %s334_s27 = scalar_lea.vmem %s185_s25, 32 }
 0x102   : > { %p329_p4 = scmp.ne.s32.totalorder %s185_s25, %s328_s26  ;;  %p335_p9 = scmp.lt.s32.totalorder %s185_s25, %s185_s25 }
 0x103   : > { %p336_p11 = scmp.lt.s32.totalorder %s334_s27, %s328_s26 }
 0x104   : > { %p330_p5 = pnand %p329_p4, %p261_p3 }
 0x105   : > { %p337_p10 = por %p336_p11, %p335_p9 }
 0x106   : > { %p331_p6 = pneg %p330_p5 }
 0x108   : > { %p338_p12 = pnand %p337_p10, %p331_p6 }
 0x10a   : > { %341 = shalt.err (!%p338_p12)
}
 0x10b   : > { %253 = dma.vmem_to_hbm [thread:$0]  (%p261_p3), %s185_s25, 16, %s528_s2, [#allocation8]  }
 0x10c   : > { %373 = dma.done.wait (%p261_p3), [#allocation8], 16  }
 0x10d   : > { %375 = vsyncadd (%p261_p3), [#allocation8], 4294967280 }
 0x10e PF: > { %p14_p13 = scmp.ge.s32.totalorder %s438_s15, 4   ;;  %s533_s11 = smov %s382_s12 }
 0x10f   : > { %s534_s12 = smov %s386_s13  ;;  %s535_s13 = smov %s448_s18 }
 0x110   : > { %s536_s14 = smov %s438_s15  ;;  %16 = sbr.rel (!%p14_p13) target bundleno = 6 (0x6), region = 78 }
 0x115   :  { %197 = vsyncpa [#allocation7], 1 }
 0x116   :  { %199 = vsyncpa [#allocation7 + $0x1], 1 }
 0x117   :  { %200 = vsyncpa [#allocation8], 1 }
 0x118   :  { %202 = vsyncpa [#allocation8 + $0x1], 1 }

</bundles_post_ra>
